<compile_context>
chip_gen: v7x
topology: tpu7x:2x2x1
jax: 0.10.0
libtpu: 0.0.40
codegen_flags: <defaults>
</compile_context>

<pallas_src>
import functools

import jax
import jax.numpy as jnp
from jax.experimental import pallas as pl
from jax.experimental.pallas import tpu as pltpu

# Small, shape-consistent stand-in for GPT_CONFIG_124M
CFG = dict(
    vocab_size=256,
    context_length=16,
    emb_dim=32,
    n_heads=4,
    n_layers=2,
    drop_rate=0.0,   # dropout is identity (eval mode)
    qkv_bias=False,
)


# --------------------------------------------------------------------------
# In-kernel helpers (pure f32 elementwise math)
# --------------------------------------------------------------------------
def _layer_norm(x, g, b):
    # eps=1e-5, biased variance (matches the custom LayerNorm, unbiased=False)
    mean = jnp.mean(x, axis=-1, keepdims=True)
    var = jnp.mean((x - mean) ** 2, axis=-1, keepdims=True)
    return (x - mean) * jax.lax.rsqrt(var + 1e-5) * g + b


def _gelu_tanh(x):
    # 0.5*x*(1 + tanh(sqrt(2/pi)*(x + 0.044715*x^3)))  -- matches the book's GELU
    c = 0.7978845608028654  # sqrt(2/pi)
    return 0.5 * x * (1.0 + jnp.tanh(c * (x + 0.044715 * x * x * x)))


# --------------------------------------------------------------------------
# Fully fused GPT-2 kernel: grid = (batch, layer)
#   batch axis  -> "parallel"  (one [T, E] row block per step; megacore on v7x)
#   layer axis  -> "arbitrary" (residual carried in VMEM scratch across layers)
# --------------------------------------------------------------------------
def _gpt2_kernel(x_ref, ln1g_ref, ln1b_ref, wqkv_ref, wo_ref, bo_ref,
                 ln2g_ref, ln2b_ref, w1_ref, b1_ref, w2_ref, b2_ref,
                 fng_ref, fnb_ref, outw_ref, o_ref, xs_ref, *, T, H, hd, L):
    l = pl.program_id(1)
    E = H * hd

    # Load the embedded tokens into the resident residual stream at layer 0.
    @pl.when(l == 0)
    def _():
        xs_ref[...] = x_ref[...]

    x = xs_ref[...]                                    # [T, E] f32 residual

    # ---- LN1 -> fused QKV projection (softmax scale pre-baked into Q weights)
    h1 = _layer_norm(x, ln1g_ref[0], ln1b_ref[0])
    qkv = jnp.dot(h1.astype(wqkv_ref.dtype), wqkv_ref[0],
                  preferred_element_type=jnp.float32)  # [T, 3E]

    # ---- causal attention; heads unrolled (H is tiny), one lane-dense concat,
    #      no scratch buffer and no masked sub-128 stores.
    qi = jax.lax.broadcasted_iota(jnp.int32, (T, T), 0)
    ki = jax.lax.broadcasted_iota(jnp.int32, (T, T), 1)
    causal = ki > qi
    neg = jnp.float32(-1e30)                           # finite mask (NaN-safe)
    ctx_heads = []
    for hh in range(H):
        c0 = hh * hd
        q = qkv[:, c0:c0 + hd]                         # [T, hd] (scale baked in)
        k = qkv[:, E + c0:E + c0 + hd]
        v = qkv[:, 2 * E + c0:2 * E + c0 + hd]
        # q @ k^T without an explicit transpose op
        s = jax.lax.dot_general(q, k, (((1,), (1,)), ((), ())),
                                preferred_element_type=jnp.float32)  # [T, T]
        s = jnp.where(causal, neg, s)
        s = s - jnp.max(s, axis=-1, keepdims=True)
        p = jnp.exp(s)
        p = p * pl.reciprocal(jnp.sum(p, axis=-1, keepdims=True), approx=True)
        ctx_heads.append(jnp.dot(p, v, preferred_element_type=jnp.float32))
    ctx = jnp.concatenate(ctx_heads, axis=-1)          # [T, E], lane-dense value

    # ---- output projection + bias + residual (epilogue add)
    attn = jnp.dot(ctx.astype(wo_ref.dtype), wo_ref[0],
                   preferred_element_type=jnp.float32) + bo_ref[0]
    x = x + attn

    # ---- LN2 -> FFN (Linear -> GELU -> Linear) -> residual
    h2 = _layer_norm(x, ln2g_ref[0], ln2b_ref[0])
    mid = jnp.dot(h2.astype(w1_ref.dtype), w1_ref[0],
                  preferred_element_type=jnp.float32) + b1_ref[0]
    mid = _gelu_tanh(mid)
    ff = jnp.dot(mid.astype(w2_ref.dtype), w2_ref[0],
                 preferred_element_type=jnp.float32) + b2_ref[0]
    x = x + ff
    xs_ref[...] = x                                    # carry residual to next layer

    # ---- last layer: final LayerNorm + vocab head, lane-dense [T, V] store
    @pl.when(l == L - 1)
    def _():
        hf = _layer_norm(x, fng_ref[...], fnb_ref[...])
        o_ref[...] = jnp.dot(hf.astype(outw_ref.dtype), outw_ref[...],
                             preferred_element_type=jnp.float32)


def gpt2_fused(p, x2d, *, B, T):
    L, E, _ = p["w_qkv"].shape
    H = CFG["n_heads"]
    hd = E // H
    Hid = p["w1"].shape[2]
    V = p["out_w"].shape[1]
    M = B * T

    kern = functools.partial(_gpt2_kernel, T=T, H=H, hd=hd, L=L)

    def per_layer(d0, d1):
        return pl.BlockSpec((1, d0, d1), lambda b, l: (l, 0, 0))

    # Advisory cost hint so XLA schedules neighbouring ops around the call.
    flops_layer = 2 * T * E * (3 * E + E + 2 * Hid) + 4 * H * T * T * hd
    flops = B * (L * flops_layer + 2 * T * E * V)
    transcendentals = B * L * (H * T * T + T * Hid)
    bytes_accessed = (
        2 * (p["w_qkv"].size + p["wo"].size + p["w1"].size
             + p["w2"].size + p["out_w"].size)          # bf16 weights
        + 4 * (M * E + M * V))                          # f32 activations in/out
    cost = pl.CostEstimate(flops=int(flops),
                           transcendentals=int(transcendentals),
                           bytes_accessed=int(bytes_accessed))

    return pl.pallas_call(
        kern,
        out_shape=jax.ShapeDtypeStruct((M, V), jnp.float32),
        grid=(B, L),
        in_specs=[
            pl.BlockSpec((T, E), lambda b, l: (b, 0)),       # embedded tokens
            per_layer(1, E), per_layer(1, E),                # ln1 gamma / beta
            per_layer(E, 3 * E),                             # fused QKV weight
            per_layer(E, E), per_layer(1, E),                # wo, bo
            per_layer(1, E), per_layer(1, E),                # ln2 gamma / beta
            per_layer(E, Hid), per_layer(1, Hid),            # w1, b1
            per_layer(Hid, E), per_layer(1, E),              # w2, b2
            pl.BlockSpec((1, E), lambda b, l: (0, 0)),       # final norm gamma
            pl.BlockSpec((1, E), lambda b, l: (0, 0)),       # final norm beta
            pl.BlockSpec((E, V), lambda b, l: (0, 0)),       # out_head weight
        ],
        out_specs=pl.BlockSpec((T, V), lambda b, l: (b, 0)),
        scratch_shapes=[pltpu.VMEM((T, E), jnp.float32)],    # residual carry
        compiler_params=pltpu.CompilerParams(
            dimension_semantics=("parallel", "arbitrary")),
        cost_estimate=cost,
    )(x2d, p["ln1_g"], p["ln1_b"], p["w_qkv"], p["wo"], p["bo"],
      p["ln2_g"], p["ln2_b"], p["w1"], p["b1"], p["w2"], p["b2"],
      p["fn_g"], p["fn_b"], p["out_w"])


# --------------------------------------------------------------------------
# Model parameters & forward
# --------------------------------------------------------------------------
def init_params(key):
    V = CFG["vocab_size"]
    E = CFG["emb_dim"]
    C = CFG["context_length"]
    L = CFG["n_layers"]
    H = CFG["n_heads"]
    hd = E // H
    Hid = 4 * E
    scale = 1.0 / (hd ** 0.5)

    def nrm(k, shape):
        return 0.02 * jax.random.normal(k, shape, jnp.float32)

    keys = jax.random.split(key, 3 + L)
    w_qkv, wo, w1, w2 = [], [], [], []
    for li in range(L):
        ks = jax.random.split(keys[3 + li], 6)
        wq, wk, wv = nrm(ks[0], (E, E)), nrm(ks[1], (E, E)), nrm(ks[2], (E, E))
        # Bake the 1/sqrt(head_dim) softmax scale into the Q columns (free).
        w_qkv.append(jnp.concatenate([wq * scale, wk, wv], axis=1))  # qkv_bias=False
        wo.append(nrm(ks[3], (E, E)))
        w1.append(nrm(ks[4], (E, Hid)))
        w2.append(nrm(ks[5], (Hid, E)))

    bf = jnp.bfloat16
    return {
        "tok_emb": nrm(keys[0], (V, E)),
        "pos_emb": nrm(keys[1], (C, E)),
        "fn_g": jnp.ones((1, E), jnp.float32),
        "fn_b": jnp.zeros((1, E), jnp.float32),
        "out_w": nrm(keys[2], (E, V)).astype(bf),      # Linear(E, V, bias=False)
        "ln1_g": jnp.ones((L, 1, E), jnp.float32),
        "ln1_b": jnp.zeros((L, 1, E), jnp.float32),
        "w_qkv": jnp.stack(w_qkv).astype(bf),          # [L, E, 3E]
        "wo": jnp.stack(wo).astype(bf),                # [L, E, E]
        "bo": jnp.zeros((L, 1, E), jnp.float32),
        "ln2_g": jnp.ones((L, 1, E), jnp.float32),
        "ln2_b": jnp.zeros((L, 1, E), jnp.float32),
        "w1": jnp.stack(w1).astype(bf),                # [L, E, 4E]
        "b1": jnp.zeros((L, 1, Hid), jnp.float32),
        "w2": jnp.stack(w2).astype(bf),                # [L, 4E, E]
        "b2": jnp.zeros((L, 1, E), jnp.float32),
    }


@jax.jit
def gpt2_forward(params, in_idx):
    B, T = in_idx.shape
    E = CFG["emb_dim"]
    V = CFG["vocab_size"]

    # Embedding gather + positional add: plain-JAX glue (XLA fuses the add into
    # the gather epilogue).  drop_emb is identity (eval mode, drop_rate=0.0).
    x = params["tok_emb"][in_idx] + params["pos_emb"][:T][None, :, :]
    x2d = x.reshape(B * T, E)

    logits2d = gpt2_fused(params, x2d, B=B, T=T)
    return logits2d.reshape(B, T, V)


# --------------------------------------------------------------------------
if __name__ == "__main__":
    key = jax.random.PRNGKey(0)
    pkey, ikey = jax.random.split(key)
    params = init_params(pkey)

    B, T = 2, 8
    in_idx = jax.random.randint(ikey, (B, T), 0, CFG["vocab_size"], jnp.int32)

    logits = jax.block_until_ready(gpt2_forward(params, in_idx))

    assert logits.shape == (B, T, CFG["vocab_size"])
    assert logits.dtype == jnp.float32
    assert bool(jnp.all(jnp.isfinite(logits)))
    print("KERNEL_OK")
</pallas_src>

<mosaic_0001>
module attributes {stable_mosaic.version = 11 : i64} {
  func.func @_gpt2_kernel(%arg0: i32, %arg1: i32, %arg2: memref<8x32xf32, #tpu.memory_space<vmem>>, %arg3: memref<1x1x32xf32, #tpu.memory_space<vmem>>, %arg4: memref<1x1x32xf32, #tpu.memory_space<vmem>>, %arg5: memref<1x32x96xbf16, #tpu.memory_space<vmem>>, %arg6: memref<1x32x32xbf16, #tpu.memory_space<vmem>>, %arg7: memref<1x1x32xf32, #tpu.memory_space<vmem>>, %arg8: memref<1x1x32xf32, #tpu.memory_space<vmem>>, %arg9: memref<1x1x32xf32, #tpu.memory_space<vmem>>, %arg10: memref<1x32x128xbf16, #tpu.memory_space<vmem>>, %arg11: memref<1x1x128xf32, #tpu.memory_space<vmem>>, %arg12: memref<1x128x32xbf16, #tpu.memory_space<vmem>>, %arg13: memref<1x1x32xf32, #tpu.memory_space<vmem>>, %arg14: memref<1x32xf32, #tpu.memory_space<vmem>>, %arg15: memref<1x32xf32, #tpu.memory_space<vmem>>, %arg16: memref<32x256xbf16, #tpu.memory_space<vmem>>, %arg17: memref<8x256xf32, #tpu.memory_space<vmem>>, %arg18: memref<8x32xf32, #tpu.memory_space<vmem>>) attributes {dimension_semantics = [#tpu.dimension_semantics<parallel>, #tpu.dimension_semantics<arbitrary>], iteration_bounds = array<i64: 2, 2>, scalar_prefetch = 0 : i64, scratch_operands = 1 : i64, tpu.core_type = #tpu.core_type<tc>, window_params = [{transform_indices = @transform_0, window_bounds = array<i64: 8, 32>}, {transform_indices = @transform_1, window_bounds = array<i64: 1, 1, 32>}, {transform_indices = @transform_2, window_bounds = array<i64: 1, 1, 32>}, {transform_indices = @transform_3, window_bounds = array<i64: 1, 32, 96>}, {transform_indices = @transform_4, window_bounds = array<i64: 1, 32, 32>}, {transform_indices = @transform_5, window_bounds = array<i64: 1, 1, 32>}, {transform_indices = @transform_6, window_bounds = array<i64: 1, 1, 32>}, {transform_indices = @transform_7, window_bounds = array<i64: 1, 1, 32>}, {transform_indices = @transform_8, window_bounds = array<i64: 1, 32, 128>}, {transform_indices = @transform_9, window_bounds = array<i64: 1, 1, 128>}, {transform_indices = @transform_10, window_bounds = array<i64: 1, 128, 32>}, {transform_indices = @transform_11, window_bounds = array<i64: 1, 1, 32>}, {pipeline_mode = #tpu.pipeline_mode<synchronous>, transform_indices = @transform_12, window_bounds = array<i64: 1, 32>}, {pipeline_mode = #tpu.pipeline_mode<synchronous>, transform_indices = @transform_13, window_bounds = array<i64: 1, 32>}, {pipeline_mode = #tpu.pipeline_mode<synchronous>, transform_indices = @transform_14, window_bounds = array<i64: 32, 256>}, {transform_indices = @transform_15, window_bounds = array<i64: 8, 256>}]} {
    %c0_i32 = arith.constant 0 : i32
    %0 = arith.cmpi eq, %arg1, %c0_i32 : i32
    %1 = arith.extui %0 : i1 to i32
    %c0_i32_0 = arith.constant 0 : i32
    %2 = arith.cmpi ne, %1, %c0_i32_0 : i32
    scf.if %2 {
      %c0_75 = arith.constant 0 : index
      %c0_76 = arith.constant 0 : index
      %175 = vector.load %arg2[%c0_75, %c0_76] : memref<8x32xf32, #tpu.memory_space<vmem>>, vector<8x32xf32>
      %c0_77 = arith.constant 0 : index
      %c0_78 = arith.constant 0 : index
      %176 = vector.load %arg18[%c0_77, %c0_78] : memref<8x32xf32, #tpu.memory_space<vmem>>, vector<8x32xf32>
      tpu.vector_store %arg18[%c0_77, %c0_78], %175 {strides = array<i32>} : memref<8x32xf32, #tpu.memory_space<vmem>>, vector<8x32xf32>,
    } else {
    }
    %c0 = arith.constant 0 : index
    %c0_1 = arith.constant 0 : index
    %3 = vector.load %arg18[%c0, %c0_1] : memref<8x32xf32, #tpu.memory_space<vmem>>, vector<8x32xf32>
    %c0_2 = arith.constant 0 : index
    %c0_3 = arith.constant 0 : index
    %c0_4 = arith.constant 0 : index
    %4 = vector.load %arg3[%c0_2, %c0_3, %c0_4] : memref<1x1x32xf32, #tpu.memory_space<vmem>>, vector<1x1x32xf32>
    %5 = vector.shape_cast %4 : vector<1x1x32xf32> to vector<1x32xf32>
    %c0_5 = arith.constant 0 : index
    %c0_6 = arith.constant 0 : index
    %c0_7 = arith.constant 0 : index
    %6 = vector.load %arg4[%c0_5, %c0_6, %c0_7] : memref<1x1x32xf32, #tpu.memory_space<vmem>>, vector<1x1x32xf32>
    %7 = vector.shape_cast %6 : vector<1x1x32xf32> to vector<1x32xf32>
    %cst = arith.constant dense<0.000000e+00> : vector<8xf32>
    %8 = vector.multi_reduction <add>, %3, %cst [1] : vector<8x32xf32> to vector<8xf32>
    %9 = vector.shape_cast %8 : vector<8xf32> to vector<8x1xf32>
    %cst_8 = arith.constant 3.200000e+01 : f32
    %10 = vector.broadcast %cst_8 : f32 to vector<8x1xf32>
    %11 = arith.divf %9, %10 : vector<8x1xf32>
    %12 = vector.broadcast %11 : vector<8x1xf32> to vector<8x32xf32>
    %13 = arith.subf %3, %12 : vector<8x32xf32>
    %14 = arith.mulf %13, %13 : vector<8x32xf32>
    %cst_9 = arith.constant dense<0.000000e+00> : vector<8xf32>
    %15 = vector.multi_reduction <add>, %14, %cst_9 [1] : vector<8x32xf32> to vector<8xf32>
    %16 = vector.shape_cast %15 : vector<8xf32> to vector<8x1xf32>
    %cst_10 = arith.constant 3.200000e+01 : f32
    %17 = vector.broadcast %cst_10 : f32 to vector<8x1xf32>
    %18 = arith.divf %16, %17 : vector<8x1xf32>
    %19 = vector.broadcast %11 : vector<8x1xf32> to vector<8x32xf32>
    %20 = arith.subf %3, %19 : vector<8x32xf32>
    %cst_11 = arith.constant 9.99999974E-6 : f32
    %21 = vector.broadcast %cst_11 : f32 to vector<8x1xf32>
    %22 = arith.addf %18, %21 : vector<8x1xf32>
    %23 = math.rsqrt %22 : vector<8x1xf32>
    %24 = vector.broadcast %23 : vector<8x1xf32> to vector<8x32xf32>
    %25 = arith.mulf %20, %24 : vector<8x32xf32>
    %26 = vector.broadcast %5 : vector<1x32xf32> to vector<8x32xf32>
    %27 = arith.mulf %25, %26 : vector<8x32xf32>
    %28 = vector.broadcast %7 : vector<1x32xf32> to vector<8x32xf32>
    %29 = arith.addf %27, %28 : vector<8x32xf32>
    %30 = arith.truncf %29 : vector<8x32xf32> to vector<8x32xbf16>
    %c0_12 = arith.constant 0 : index
    %c0_13 = arith.constant 0 : index
    %c0_14 = arith.constant 0 : index
    %31 = vector.load %arg5[%c0_12, %c0_13, %c0_14] : memref<1x32x96xbf16, #tpu.memory_space<vmem>>, vector<1x32x96xbf16>
    %32 = vector.shape_cast %31 : vector<1x32x96xbf16> to vector<32x96xbf16>
    %cst_15 = arith.constant dense<0.000000e+00> : vector<8x96xf32>
    %33 = tpu.matmul %30, %32, %cst_15 {dimension_numbers = #tpu.dot_dimension_numbers<[1], [0], [0], [1], [0, 0, 1, 1], [], []>} : vector<8x32xbf16>, vector<32x96xbf16>, vector<8x96xf32> -> vector<8x96xf32>
    %34 = tpu.iota {dimensions = array<i32: 0>} : vector<8x8xi32>
    %35 = tpu.iota {dimensions = array<i32: 1>} : vector<8x8xi32>
    %36 = arith.cmpi sgt, %35, %34 : vector<8x8xi32>
    %37 = vector.extract_strided_slice %33 {offsets = [0, 0], sizes = [8, 8], strides = [1, 1]} : vector<8x96xf32> to vector<8x8xf32>
    %38 = vector.extract_strided_slice %33 {offsets = [0, 32], sizes = [8, 8], strides = [1, 1]} : vector<8x96xf32> to vector<8x8xf32>
    %39 = vector.extract_strided_slice %33 {offsets = [0, 64], sizes = [8, 8], strides = [1, 1]} : vector<8x96xf32> to vector<8x8xf32>
    %cst_16 = arith.constant dense<0.000000e+00> : vector<8x8xf32>
    %40 = tpu.matmul %37, %38, %cst_16 {dimension_numbers = #tpu.dot_dimension_numbers<[1], [1], [0], [0], [0, 0, 1, 0], [], []>} : vector<8x8xf32>, vector<8x8xf32>, vector<8x8xf32> -> vector<8x8xf32>
    %cst_17 = arith.constant -1.000000e+30 : f32
    %41 = vector.broadcast %cst_17 : f32 to vector<8x8xf32>
    %42 = arith.select %36, %41, %40 : vector<8x8xi1>, vector<8x8xf32>
    %cst_18 = arith.constant dense<0xFF800000> : vector<8xf32>
    %43 = vector.multi_reduction <maximumf>, %42, %cst_18 [1] : vector<8x8xf32> to vector<8xf32>
    %44 = vector.shape_cast %43 : vector<8xf32> to vector<8x1xf32>
    %45 = vector.broadcast %44 : vector<8x1xf32> to vector<8x8xf32>
    %46 = arith.subf %42, %45 : vector<8x8xf32>
    %47 = math.exp %46 : vector<8x8xf32>
    %cst_19 = arith.constant dense<0.000000e+00> : vector<8xf32>
    %48 = vector.multi_reduction <add>, %47, %cst_19 [1] : vector<8x8xf32> to vector<8xf32>
    %49 = vector.shape_cast %48 : vector<8xf32> to vector<8x1xf32>
    %50 = tpu.reciprocal %49 {approx = true} : vector<8x1xf32> -> vector<8x1xf32>
    %51 = vector.broadcast %50 : vector<8x1xf32> to vector<8x8xf32>
    %52 = arith.mulf %47, %51 : vector<8x8xf32>
    %cst_20 = arith.constant dense<0.000000e+00> : vector<8x8xf32>
    %53 = tpu.matmul %52, %39, %cst_20 {dimension_numbers = #tpu.dot_dimension_numbers<[1], [0], [0], [1], [0, 0, 1, 1], [], []>} : vector<8x8xf32>, vector<8x8xf32>, vector<8x8xf32> -> vector<8x8xf32>
    %54 = vector.extract_strided_slice %33 {offsets = [0, 8], sizes = [8, 8], strides = [1, 1]} : vector<8x96xf32> to vector<8x8xf32>
    %55 = vector.extract_strided_slice %33 {offsets = [0, 40], sizes = [8, 8], strides = [1, 1]} : vector<8x96xf32> to vector<8x8xf32>
    %56 = vector.extract_strided_slice %33 {offsets = [0, 72], sizes = [8, 8], strides = [1, 1]} : vector<8x96xf32> to vector<8x8xf32>
    %cst_21 = arith.constant dense<0.000000e+00> : vector<8x8xf32>
    %57 = tpu.matmul %54, %55, %cst_21 {dimension_numbers = #tpu.dot_dimension_numbers<[1], [1], [0], [0], [0, 0, 1, 0], [], []>} : vector<8x8xf32>, vector<8x8xf32>, vector<8x8xf32> -> vector<8x8xf32>
    %cst_22 = arith.constant -1.000000e+30 : f32
    %58 = vector.broadcast %cst_22 : f32 to vector<8x8xf32>
    %59 = arith.select %36, %58, %57 : vector<8x8xi1>, vector<8x8xf32>
    %cst_23 = arith.constant dense<0xFF800000> : vector<8xf32>
    %60 = vector.multi_reduction <maximumf>, %59, %cst_23 [1] : vector<8x8xf32> to vector<8xf32>
    %61 = vector.shape_cast %60 : vector<8xf32> to vector<8x1xf32>
    %62 = vector.broadcast %61 : vector<8x1xf32> to vector<8x8xf32>
    %63 = arith.subf %59, %62 : vector<8x8xf32>
    %64 = math.exp %63 : vector<8x8xf32>
    %cst_24 = arith.constant dense<0.000000e+00> : vector<8xf32>
    %65 = vector.multi_reduction <add>, %64, %cst_24 [1] : vector<8x8xf32> to vector<8xf32>
    %66 = vector.shape_cast %65 : vector<8xf32> to vector<8x1xf32>
    %67 = tpu.reciprocal %66 {approx = true} : vector<8x1xf32> -> vector<8x1xf32>
    %68 = vector.broadcast %67 : vector<8x1xf32> to vector<8x8xf32>
    %69 = arith.mulf %64, %68 : vector<8x8xf32>
    %cst_25 = arith.constant dense<0.000000e+00> : vector<8x8xf32>
    %70 = tpu.matmul %69, %56, %cst_25 {dimension_numbers = #tpu.dot_dimension_numbers<[1], [0], [0], [1], [0, 0, 1, 1], [], []>} : vector<8x8xf32>, vector<8x8xf32>, vector<8x8xf32> -> vector<8x8xf32>
    %71 = vector.extract_strided_slice %33 {offsets = [0, 16], sizes = [8, 8], strides = [1, 1]} : vector<8x96xf32> to vector<8x8xf32>
    %72 = vector.extract_strided_slice %33 {offsets = [0, 48], sizes = [8, 8], strides = [1, 1]} : vector<8x96xf32> to vector<8x8xf32>
    %73 = vector.extract_strided_slice %33 {offsets = [0, 80], sizes = [8, 8], strides = [1, 1]} : vector<8x96xf32> to vector<8x8xf32>
    %cst_26 = arith.constant dense<0.000000e+00> : vector<8x8xf32>
    %74 = tpu.matmul %71, %72, %cst_26 {dimension_numbers = #tpu.dot_dimension_numbers<[1], [1], [0], [0], [0, 0, 1, 0], [], []>} : vector<8x8xf32>, vector<8x8xf32>, vector<8x8xf32> -> vector<8x8xf32>
    %cst_27 = arith.constant -1.000000e+30 : f32
    %75 = vector.broadcast %cst_27 : f32 to vector<8x8xf32>
    %76 = arith.select %36, %75, %74 : vector<8x8xi1>, vector<8x8xf32>
    %cst_28 = arith.constant dense<0xFF800000> : vector<8xf32>
    %77 = vector.multi_reduction <maximumf>, %76, %cst_28 [1] : vector<8x8xf32> to vector<8xf32>
    %78 = vector.shape_cast %77 : vector<8xf32> to vector<8x1xf32>
    %79 = vector.broadcast %78 : vector<8x1xf32> to vector<8x8xf32>
    %80 = arith.subf %76, %79 : vector<8x8xf32>
    %81 = math.exp %80 : vector<8x8xf32>
    %cst_29 = arith.constant dense<0.000000e+00> : vector<8xf32>
    %82 = vector.multi_reduction <add>, %81, %cst_29 [1] : vector<8x8xf32> to vector<8xf32>
    %83 = vector.shape_cast %82 : vector<8xf32> to vector<8x1xf32>
    %84 = tpu.reciprocal %83 {approx = true} : vector<8x1xf32> -> vector<8x1xf32>
    %85 = vector.broadcast %84 : vector<8x1xf32> to vector<8x8xf32>
    %86 = arith.mulf %81, %85 : vector<8x8xf32>
    %cst_30 = arith.constant dense<0.000000e+00> : vector<8x8xf32>
    %87 = tpu.matmul %86, %73, %cst_30 {dimension_numbers = #tpu.dot_dimension_numbers<[1], [0], [0], [1], [0, 0, 1, 1], [], []>} : vector<8x8xf32>, vector<8x8xf32>, vector<8x8xf32> -> vector<8x8xf32>
    %88 = vector.extract_strided_slice %33 {offsets = [0, 24], sizes = [8, 8], strides = [1, 1]} : vector<8x96xf32> to vector<8x8xf32>
    %89 = vector.extract_strided_slice %33 {offsets = [0, 56], sizes = [8, 8], strides = [1, 1]} : vector<8x96xf32> to vector<8x8xf32>
    %90 = vector.extract_strided_slice %33 {offsets = [0, 88], sizes = [8, 8], strides = [1, 1]} : vector<8x96xf32> to vector<8x8xf32>
    %cst_31 = arith.constant dense<0.000000e+00> : vector<8x8xf32>
    %91 = tpu.matmul %88, %89, %cst_31 {dimension_numbers = #tpu.dot_dimension_numbers<[1], [1], [0], [0], [0, 0, 1, 0], [], []>} : vector<8x8xf32>, vector<8x8xf32>, vector<8x8xf32> -> vector<8x8xf32>
    %cst_32 = arith.constant -1.000000e+30 : f32
    %92 = vector.broadcast %cst_32 : f32 to vector<8x8xf32>
    %93 = arith.select %36, %92, %91 : vector<8x8xi1>, vector<8x8xf32>
    %cst_33 = arith.constant dense<0xFF800000> : vector<8xf32>
    %94 = vector.multi_reduction <maximumf>, %93, %cst_33 [1] : vector<8x8xf32> to vector<8xf32>
    %95 = vector.shape_cast %94 : vector<8xf32> to vector<8x1xf32>
    %96 = vector.broadcast %95 : vector<8x1xf32> to vector<8x8xf32>
    %97 = arith.subf %93, %96 : vector<8x8xf32>
    %98 = math.exp %97 : vector<8x8xf32>
    %cst_34 = arith.constant dense<0.000000e+00> : vector<8xf32>
    %99 = vector.multi_reduction <add>, %98, %cst_34 [1] : vector<8x8xf32> to vector<8xf32>
    %100 = vector.shape_cast %99 : vector<8xf32> to vector<8x1xf32>
    %101 = tpu.reciprocal %100 {approx = true} : vector<8x1xf32> -> vector<8x1xf32>
    %102 = vector.broadcast %101 : vector<8x1xf32> to vector<8x8xf32>
    %103 = arith.mulf %98, %102 : vector<8x8xf32>
    %cst_35 = arith.constant dense<0.000000e+00> : vector<8x8xf32>
    %104 = tpu.matmul %103, %90, %cst_35 {dimension_numbers = #tpu.dot_dimension_numbers<[1], [0], [0], [1], [0, 0, 1, 1], [], []>} : vector<8x8xf32>, vector<8x8xf32>, vector<8x8xf32> -> vector<8x8xf32>
    %105 = tpu.concatenate %53, %70, %87, %104 in 1 : vector<8x8xf32>, vector<8x8xf32>, vector<8x8xf32>, vector<8x8xf32> -> vector<8x32xf32>
    %106 = arith.truncf %105 : vector<8x32xf32> to vector<8x32xbf16>
    %c0_36 = arith.constant 0 : index
    %c0_37 = arith.constant 0 : index
    %c0_38 = arith.constant 0 : index
    %107 = vector.load %arg6[%c0_36, %c0_37, %c0_38] : memref<1x32x32xbf16, #tpu.memory_space<vmem>>, vector<1x32x32xbf16>
    %108 = vector.shape_cast %107 : vector<1x32x32xbf16> to vector<32x32xbf16>
    %cst_39 = arith.constant dense<0.000000e+00> : vector<8x32xf32>
    %109 = tpu.matmul %106, %108, %cst_39 {dimension_numbers = #tpu.dot_dimension_numbers<[1], [0], [0], [1], [0, 0, 1, 1], [], []>} : vector<8x32xbf16>, vector<32x32xbf16>, vector<8x32xf32> -> vector<8x32xf32>
    %c0_40 = arith.constant 0 : index
    %c0_41 = arith.constant 0 : index
    %c0_42 = arith.constant 0 : index
    %110 = vector.load %arg7[%c0_40, %c0_41, %c0_42] : memref<1x1x32xf32, #tpu.memory_space<vmem>>, vector<1x1x32xf32>
    %111 = vector.shape_cast %110 : vector<1x1x32xf32> to vector<1x32xf32>
    %112 = vector.broadcast %111 : vector<1x32xf32> to vector<8x32xf32>
    %113 = arith.addf %109, %112 : vector<8x32xf32>
    %114 = arith.addf %3, %113 : vector<8x32xf32>
    %c0_43 = arith.constant 0 : index
    %c0_44 = arith.constant 0 : index
    %c0_45 = arith.constant 0 : index
    %115 = vector.load %arg8[%c0_43, %c0_44, %c0_45] : memref<1x1x32xf32, #tpu.memory_space<vmem>>, vector<1x1x32xf32>
    %116 = vector.shape_cast %115 : vector<1x1x32xf32> to vector<1x32xf32>
    %c0_46 = arith.constant 0 : index
    %c0_47 = arith.constant 0 : index
    %c0_48 = arith.constant 0 : index
    %117 = vector.load %arg9[%c0_46, %c0_47, %c0_48] : memref<1x1x32xf32, #tpu.memory_space<vmem>>, vector<1x1x32xf32>
    %118 = vector.shape_cast %117 : vector<1x1x32xf32> to vector<1x32xf32>
    %cst_49 = arith.constant dense<0.000000e+00> : vector<8xf32>
    %119 = vector.multi_reduction <add>, %114, %cst_49 [1] : vector<8x32xf32> to vector<8xf32>
    %120 = vector.shape_cast %119 : vector<8xf32> to vector<8x1xf32>
    %cst_50 = arith.constant 3.200000e+01 : f32
    %121 = vector.broadcast %cst_50 : f32 to vector<8x1xf32>
    %122 = arith.divf %120, %121 : vector<8x1xf32>
    %123 = vector.broadcast %122 : vector<8x1xf32> to vector<8x32xf32>
    %124 = arith.subf %114, %123 : vector<8x32xf32>
    %125 = arith.mulf %124, %124 : vector<8x32xf32>
    %cst_51 = arith.constant dense<0.000000e+00> : vector<8xf32>
    %126 = vector.multi_reduction <add>, %125, %cst_51 [1] : vector<8x32xf32> to vector<8xf32>
    %127 = vector.shape_cast %126 : vector<8xf32> to vector<8x1xf32>
    %cst_52 = arith.constant 3.200000e+01 : f32
    %128 = vector.broadcast %cst_52 : f32 to vector<8x1xf32>
    %129 = arith.divf %127, %128 : vector<8x1xf32>
    %130 = vector.broadcast %122 : vector<8x1xf32> to vector<8x32xf32>
    %131 = arith.subf %114, %130 : vector<8x32xf32>
    %cst_53 = arith.constant 9.99999974E-6 : f32
    %132 = vector.broadcast %cst_53 : f32 to vector<8x1xf32>
    %133 = arith.addf %129, %132 : vector<8x1xf32>
    %134 = math.rsqrt %133 : vector<8x1xf32>
    %135 = vector.broadcast %134 : vector<8x1xf32> to vector<8x32xf32>
    %136 = arith.mulf %131, %135 : vector<8x32xf32>
    %137 = vector.broadcast %116 : vector<1x32xf32> to vector<8x32xf32>
    %138 = arith.mulf %136, %137 : vector<8x32xf32>
    %139 = vector.broadcast %118 : vector<1x32xf32> to vector<8x32xf32>
    %140 = arith.addf %138, %139 : vector<8x32xf32>
    %141 = arith.truncf %140 : vector<8x32xf32> to vector<8x32xbf16>
    %c0_54 = arith.constant 0 : index
    %c0_55 = arith.constant 0 : index
    %c0_56 = arith.constant 0 : index
    %142 = vector.load %arg10[%c0_54, %c0_55, %c0_56] : memref<1x32x128xbf16, #tpu.memory_space<vmem>>, vector<1x32x128xbf16>
    %143 = vector.shape_cast %142 : vector<1x32x128xbf16> to vector<32x128xbf16>
    %cst_57 = arith.constant dense<0.000000e+00> : vector<8x128xf32>
    %144 = tpu.matmul %141, %143, %cst_57 {dimension_numbers = #tpu.dot_dimension_numbers<[1], [0], [0], [1], [0, 0, 1, 1], [], []>} : vector<8x32xbf16>, vector<32x128xbf16>, vector<8x128xf32> -> vector<8x128xf32>
    %c0_58 = arith.constant 0 : index
    %c0_59 = arith.constant 0 : index
    %c0_60 = arith.constant 0 : index
    %145 = vector.load %arg11[%c0_58, %c0_59, %c0_60] : memref<1x1x128xf32, #tpu.memory_space<vmem>>, vector<1x1x128xf32>
    %146 = vector.shape_cast %145 : vector<1x1x128xf32> to vector<1x128xf32>
    %147 = vector.broadcast %146 : vector<1x128xf32> to vector<8x128xf32>
    %148 = arith.addf %144, %147 : vector<8x128xf32>
    %cst_61 = arith.constant 5.000000e-01 : f32
    %149 = vector.broadcast %cst_61 : f32 to vector<8x128xf32>
    %150 = arith.mulf %149, %148 : vector<8x128xf32>
    %cst_62 = arith.constant 4.471500e-02 : f32
    %151 = vector.broadcast %cst_62 : f32 to vector<8x128xf32>
    %152 = arith.mulf %151, %148 : vector<8x128xf32>
    %153 = arith.mulf %152, %148 : vector<8x128xf32>
    %154 = arith.mulf %153, %148 : vector<8x128xf32>
    %155 = arith.addf %148, %154 : vector<8x128xf32>
    %cst_63 = arith.constant 0.797884583 : f32
    %156 = vector.broadcast %cst_63 : f32 to vector<8x128xf32>
    %157 = arith.mulf %156, %155 : vector<8x128xf32>
    %158 = math.tanh %157 : vector<8x128xf32>
    %cst_64 = arith.constant 1.000000e+00 : f32
    %159 = vector.broadcast %cst_64 : f32 to vector<8x128xf32>
    %160 = arith.addf %159, %158 : vector<8x128xf32>
    %161 = arith.mulf %150, %160 : vector<8x128xf32>
    %162 = arith.truncf %161 : vector<8x128xf32> to vector<8x128xbf16>
    %c0_65 = arith.constant 0 : index
    %c0_66 = arith.constant 0 : index
    %c0_67 = arith.constant 0 : index
    %163 = vector.load %arg12[%c0_65, %c0_66, %c0_67] : memref<1x128x32xbf16, #tpu.memory_space<vmem>>, vector<1x128x32xbf16>
    %164 = vector.shape_cast %163 : vector<1x128x32xbf16> to vector<128x32xbf16>
    %cst_68 = arith.constant dense<0.000000e+00> : vector<8x32xf32>
    %165 = tpu.matmul %162, %164, %cst_68 {dimension_numbers = #tpu.dot_dimension_numbers<[1], [0], [0], [1], [0, 0, 1, 1], [], []>} : vector<8x128xbf16>, vector<128x32xbf16>, vector<8x32xf32> -> vector<8x32xf32>
    %c0_69 = arith.constant 0 : index
    %c0_70 = arith.constant 0 : index
    %c0_71 = arith.constant 0 : index
    %166 = vector.load %arg13[%c0_69, %c0_70, %c0_71] : memref<1x1x32xf32, #tpu.memory_space<vmem>>, vector<1x1x32xf32>
    %167 = vector.shape_cast %166 : vector<1x1x32xf32> to vector<1x32xf32>
    %168 = vector.broadcast %167 : vector<1x32xf32> to vector<8x32xf32>
    %169 = arith.addf %165, %168 : vector<8x32xf32>
    %170 = arith.addf %114, %169 : vector<8x32xf32>
    %c0_72 = arith.constant 0 : index
    %c0_73 = arith.constant 0 : index
    %171 = vector.load %arg18[%c0_72, %c0_73] : memref<8x32xf32, #tpu.memory_space<vmem>>, vector<8x32xf32>
    tpu.vector_store %arg18[%c0_72, %c0_73], %170 {strides = array<i32>} : memref<8x32xf32, #tpu.memory_space<vmem>>, vector<8x32xf32>,
    %c1_i32 = arith.constant 1 : i32
    %172 = arith.cmpi eq, %arg1, %c1_i32 : i32
    %173 = arith.extui %172 : i1 to i32
    %c0_i32_74 = arith.constant 0 : i32
    %174 = arith.cmpi ne, %173, %c0_i32_74 : i32
    scf.if %174 {
      %c0_75 = arith.constant 0 : index
      %c0_76 = arith.constant 0 : index
      %175 = vector.load %arg14[%c0_75, %c0_76] : memref<1x32xf32, #tpu.memory_space<vmem>>, vector<1x32xf32>
      %c0_77 = arith.constant 0 : index
      %c0_78 = arith.constant 0 : index
      %176 = vector.load %arg15[%c0_77, %c0_78] : memref<1x32xf32, #tpu.memory_space<vmem>>, vector<1x32xf32>
      %cst_79 = arith.constant dense<0.000000e+00> : vector<8xf32>
      %177 = vector.multi_reduction <add>, %170, %cst_79 [1] : vector<8x32xf32> to vector<8xf32>
      %178 = vector.shape_cast %177 : vector<8xf32> to vector<8x1xf32>
      %cst_80 = arith.constant 3.200000e+01 : f32
      %179 = vector.broadcast %cst_80 : f32 to vector<8x1xf32>
      %180 = arith.divf %178, %179 : vector<8x1xf32>
      %181 = vector.broadcast %180 : vector<8x1xf32> to vector<8x32xf32>
      %182 = arith.subf %170, %181 : vector<8x32xf32>
      %183 = arith.mulf %182, %182 : vector<8x32xf32>
      %cst_81 = arith.constant dense<0.000000e+00> : vector<8xf32>
      %184 = vector.multi_reduction <add>, %183, %cst_81 [1] : vector<8x32xf32> to vector<8xf32>
      %185 = vector.shape_cast %184 : vector<8xf32> to vector<8x1xf32>
      %cst_82 = arith.constant 3.200000e+01 : f32
      %186 = vector.broadcast %cst_82 : f32 to vector<8x1xf32>
      %187 = arith.divf %185, %186 : vector<8x1xf32>
      %188 = vector.broadcast %180 : vector<8x1xf32> to vector<8x32xf32>
      %189 = arith.subf %170, %188 : vector<8x32xf32>
      %cst_83 = arith.constant 9.99999974E-6 : f32
      %190 = vector.broadcast %cst_83 : f32 to vector<8x1xf32>
      %191 = arith.addf %187, %190 : vector<8x1xf32>
      %192 = math.rsqrt %191 : vector<8x1xf32>
      %193 = vector.broadcast %192 : vector<8x1xf32> to vector<8x32xf32>
      %194 = arith.mulf %189, %193 : vector<8x32xf32>
      %195 = vector.broadcast %175 : vector<1x32xf32> to vector<8x32xf32>
      %196 = arith.mulf %194, %195 : vector<8x32xf32>
      %197 = vector.broadcast %176 : vector<1x32xf32> to vector<8x32xf32>
      %198 = arith.addf %196, %197 : vector<8x32xf32>
      %199 = arith.truncf %198 : vector<8x32xf32> to vector<8x32xbf16>
      %c0_84 = arith.constant 0 : index
      %c0_85 = arith.constant 0 : index
      %200 = vector.load %arg16[%c0_84, %c0_85] : memref<32x256xbf16, #tpu.memory_space<vmem>>, vector<32x256xbf16>
      %cst_86 = arith.constant dense<0.000000e+00> : vector<8x256xf32>
      %201 = tpu.matmul %199, %200, %cst_86 {dimension_numbers = #tpu.dot_dimension_numbers<[1], [0], [0], [1], [0, 0, 1, 1], [], []>} : vector<8x32xbf16>, vector<32x256xbf16>, vector<8x256xf32> -> vector<8x256xf32>
      %c0_87 = arith.constant 0 : index
      %c0_88 = arith.constant 0 : index
      %202 = vector.load %arg17[%c0_87, %c0_88] : memref<8x256xf32, #tpu.memory_space<vmem>>, vector<8x256xf32>
      tpu.vector_store %arg17[%c0_87, %c0_88], %201 {strides = array<i32>} : memref<8x256xf32, #tpu.memory_space<vmem>>, vector<8x256xf32>,
    } else {
    }
    return
  }
  func.func @transform_0(%arg0: i32, %arg1: i32) -> (i32, i32) {
    %c0_i32 = arith.constant 0 : i32
    %c0_i32_0 = arith.constant 0 : i32
    return %arg0, %c0_i32 : i32, i32
  }
  func.func @transform_1(%arg0: i32, %arg1: i32) -> (i32, i32, i32) {
    %c0_i32 = arith.constant 0 : i32
    %c0_i32_0 = arith.constant 0 : i32
    %c0_i32_1 = arith.constant 0 : i32
    return %arg1, %c0_i32, %c0_i32_0 : i32, i32, i32
  }
  func.func @transform_2(%arg0: i32, %arg1: i32) -> (i32, i32, i32) {
    %c0_i32 = arith.constant 0 : i32
    %c0_i32_0 = arith.constant 0 : i32
    %c0_i32_1 = arith.constant 0 : i32
    return %arg1, %c0_i32, %c0_i32_0 : i32, i32, i32
  }
  func.func @transform_3(%arg0: i32, %arg1: i32) -> (i32, i32, i32) {
    %c0_i32 = arith.constant 0 : i32
    %c0_i32_0 = arith.constant 0 : i32
    %c0_i32_1 = arith.constant 0 : i32
    return %arg1, %c0_i32, %c0_i32_0 : i32, i32, i32
  }
  func.func @transform_4(%arg0: i32, %arg1: i32) -> (i32, i32, i32) {
    %c0_i32 = arith.constant 0 : i32
    %c0_i32_0 = arith.constant 0 : i32
    %c0_i32_1 = arith.constant 0 : i32
    return %arg1, %c0_i32, %c0_i32_0 : i32, i32, i32
  }
  func.func @transform_5(%arg0: i32, %arg1: i32) -> (i32, i32, i32) {
    %c0_i32 = arith.constant 0 : i32
    %c0_i32_0 = arith.constant 0 : i32
    %c0_i32_1 = arith.constant 0 : i32
    return %arg1, %c0_i32, %c0_i32_0 : i32, i32, i32
  }
  func.func @transform_6(%arg0: i32, %arg1: i32) -> (i32, i32, i32) {
    %c0_i32 = arith.constant 0 : i32
    %c0_i32_0 = arith.constant 0 : i32
    %c0_i32_1 = arith.constant 0 : i32
    return %arg1, %c0_i32, %c0_i32_0 : i32, i32, i32
  }
  func.func @transform_7(%arg0: i32, %arg1: i32) -> (i32, i32, i32) {
    %c0_i32 = arith.constant 0 : i32
    %c0_i32_0 = arith.constant 0 : i32
    %c0_i32_1 = arith.constant 0 : i32
    return %arg1, %c0_i32, %c0_i32_0 : i32, i32, i32
  }
  func.func @transform_8(%arg0: i32, %arg1: i32) -> (i32, i32, i32) {
    %c0_i32 = arith.constant 0 : i32
    %c0_i32_0 = arith.constant 0 : i32
    %c0_i32_1 = arith.constant 0 : i32
    return %arg1, %c0_i32, %c0_i32_0 : i32, i32, i32
  }
  func.func @transform_9(%arg0: i32, %arg1: i32) -> (i32, i32, i32) {
    %c0_i32 = arith.constant 0 : i32
    %c0_i32_0 = arith.constant 0 : i32
    %c0_i32_1 = arith.constant 0 : i32
    return %arg1, %c0_i32, %c0_i32_0 : i32, i32, i32
  }
  func.func @transform_10(%arg0: i32, %arg1: i32) -> (i32, i32, i32) {
    %c0_i32 = arith.constant 0 : i32
    %c0_i32_0 = arith.constant 0 : i32
    %c0_i32_1 = arith.constant 0 : i32
    return %arg1, %c0_i32, %c0_i32_0 : i32, i32, i32
  }
  func.func @transform_11(%arg0: i32, %arg1: i32) -> (i32, i32, i32) {
    %c0_i32 = arith.constant 0 : i32
    %c0_i32_0 = arith.constant 0 : i32
    %c0_i32_1 = arith.constant 0 : i32
    return %arg1, %c0_i32, %c0_i32_0 : i32, i32, i32
  }
  func.func @transform_12(%arg0: i32, %arg1: i32) -> (i32, i32) {
    %c0_i32 = arith.constant 0 : i32
    %c0_i32_0 = arith.constant 0 : i32
    %c0_i32_1 = arith.constant 0 : i32
    return %c0_i32, %c0_i32_0 : i32, i32
  }
  func.func @transform_13(%arg0: i32, %arg1: i32) -> (i32, i32) {
    %c0_i32 = arith.constant 0 : i32
    %c0_i32_0 = arith.constant 0 : i32
    %c0_i32_1 = arith.constant 0 : i32
    return %c0_i32, %c0_i32_0 : i32, i32
  }
  func.func @transform_14(%arg0: i32, %arg1: i32) -> (i32, i32) {
    %c0_i32 = arith.constant 0 : i32
    %c0_i32_0 = arith.constant 0 : i32
    %c0_i32_1 = arith.constant 0 : i32
    return %c0_i32, %c0_i32_0 : i32, i32
  }
  func.func @transform_15(%arg0: i32, %arg1: i32) -> (i32, i32) {
    %c0_i32 = arith.constant 0 : i32
    %c0_i32_0 = arith.constant 0 : i32
    return %arg0, %c0_i32 : i32, i32
  }
}

</mosaic_0001>

<bundles_post_ra>
// kernel: gpt2_forward.1
= control target key start
LH: loop header
LB: loop body
LE: loop exit
PB: predicated region body
PF: predicated region fallthrough
CT: control target
= control target key end

     0   :  { %s2934_s0 = inlined_call_operand.vmem [shape: f32[16,32], index: 0, kind: input, shape index: {}]   ;;  %s2935_s1 = inlined_call_operand.vmem [shape: f32[2,1,32], index: 1, kind: input, shape index: {}]   ;;  %s2936_s2 = inlined_call_operand.vmem [shape: f32[2,1,32], index: 2, kind: input, shape index: {}]   ;;  %s2937_s3 = inlined_call_operand.vmem [shape: bf16[2,32,96], index: 3, kind: input, shape index: {}]   ;;  %s2938_s4 = inlined_call_operand.vmem [shape: bf16[2,32,32], index: 4, kind: input, shape index: {}]   ;;  %s2939_s5 = inlined_call_operand.vmem [shape: f32[2,1,32], index: 5, kind: input, shape index: {}]   ;;  %s2940_s6 = inlined_call_operand.vmem [shape: f32[2,1,32], index: 6, kind: input, shape index: {}]   ;;  %s2941_s7 = inlined_call_operand.vmem [shape: f32[2,1,32], index: 7, kind: input, shape index: {}]   ;;  %s2942_s8 = inlined_call_operand.vmem [shape: bf16[2,32,128], index: 8, kind: input, shape index: {}]   ;;  %s2943_s9 = inlined_call_operand.vmem [shape: f32[2,1,128], index: 9, kind: input, shape index: {}]   ;;  %s2944_s10 = inlined_call_operand.vmem [shape: bf16[2,128,32], index: 10, kind: input, shape index: {}]   ;;  %s2945_s11 = inlined_call_operand.vmem [shape: f32[2,1,32], index: 11, kind: input, shape index: {}]   ;;  %s2946_s12 = inlined_call_operand.vmem [shape: f32[1,32], index: 12, kind: input, shape index: {}]   ;;  %s2947_s13 = inlined_call_operand.vmem [shape: f32[1,32], index: 13, kind: input, shape index: {}]   ;;  %s2948_s14 = inlined_call_operand.vmem [shape: bf16[32,256], index: 14, kind: input, shape index: {}]   ;;  %s2949_s15 = inlined_call_operand.hbm [shape: f32[16,256], index: 15, kind: output, shape index: {}]  }
   0x1   :  { %2966 = sst [smem:[#allocation19_spill]] %s2934_s0 }
   0x2   :  { %2967 = sst [smem:[#allocation20_spill]] %s2937_s3 }
   0x3   :  { %2968 = sst [smem:[#allocation21_spill]] %s2938_s4 }
   0x4   :  { %2969 = sst [smem:[#allocation22_spill]] %s2946_s12 }
   0x5   :  { %2970 = sst [smem:[#allocation23_spill]] %s2947_s13 }
   0x6   :  { %2971 = sst [smem:[#allocation24_spill]] %s2948_s14 }
   0x7   :  { %2972 = sst [smem:[#allocation25_spill]] %s2949_s15 }
   0x8   :  { %20 = vsyncpa [#allocation4], 0 }
   0x9   :  { %22 = vsyncpa [#allocation4 + $0x1], 0  ;;  %s2567_s18 = smov 0   ;;  %s2569_s19 = smov 0  }
   0xa   :  { %s2571_s20 = smov 0   ;;  %s2573_s21 = smov 0  }
   0xb   :  { %s2575_s22 = smov 0   ;;  %s2577_s23 = smov 0  }
   0xc   :  { %s2579_s24 = smov 0   ;;  %s2581_s25 = smov 0  }
   0xd LB: > { %2973 = sst [smem:[#allocation6_spill]] %s2439_s18  ;;  %s2053_s26 = sadd.s32 4294967295, %s2467_s25   ;;  %s2467_s25 = sphi %s2581_s25, %s28_s25   ;;  %s2463_s24 = sphi %s2579_s24, %s3014_s24   ;;  %s2459_s23 = sphi %s2577_s23, %s3013_s23   ;;  %s2455_s22 = sphi %s2575_s22, %s3012_s22   ;;  %s2451_s21 = sphi %s2573_s21, %s3011_s21   ;;  %s2447_s20 = sphi %s2571_s20, %s3010_s20   ;;  %s2443_s19 = sphi %s2569_s19, %s3009_s19   ;;  %s2439_s18 = sphi %s2567_s18, %s3008_s18  }
   0xe   : > { %2974 = sst [smem:[#allocation7_spill]] %s2443_s19  ;;  %s2054_s27 = sadd.s32 4294967294, %s2467_s25  }
   0xf   : > { %2975 = sst [smem:[#allocation8_spill]] %s2447_s20  ;;  %s37_s28 = sadd.s32 1, %s2459_s23 }
  0x10   : > { %2976 = sst [smem:[#allocation9_spill]] %s2451_s21  ;;  %p38_p0 = scmp.ge.s32.totalorder %s37_s28, 2 }
  0x11   : > { %2977 = sst [smem:[#allocation10_spill]] %s2455_s22  ;;  %s40_s29 = sadd.s32 1, %s2463_s24 }
  0x12   : > { %2978 = sst [smem:[#allocation11_spill]] %s2459_s23  ;;  %p432_p1 = scmp.ne.s32.totalorder %s2447_s20, %s2443_s19 }
  0x13   : > { %2979 = sst [smem:[#allocation12_spill]] %s2463_s24  ;;  %p433_p2 = scmp.eq.s32.totalorder %s2053_s26, 3 }
  0x14   : > { %2980 = sst [smem:[#allocation13_spill]] %s2467_s25  ;;  %s3016_s28 = smov (%p38_p0, %s37_s28), 0 }
  0x15   : > { %2981 = sst [smem:[#allocation14_spill]] %s3016_s28  ;;  %s3018_s29 = smov (!%p38_p0, %s40_s29), %s2463_s24 }
  0x16   : > { %p2616_p3 = por %p433_p2, %p432_p1  ;;  %p438_p4 = scmp.ne.s32.totalorder %s2443_s19, %s2439_s18 }
  0x17   : > { %p42_p5 = scmp.ge.s32.totalorder %s3018_s29, 2  ;;  %p439_p6 = scmp.eq.s32.totalorder %s2054_s27, 3 }
  0x18   : > { %s2982_s30 = scalar_select %p2616_p3, 1, 0 }
  0x19   : > { %p2057_p7 = scmp.ge.s32.totalorder %s2467_s25, 1  ;;  %p547_p8 = scmp.lt.s32.totalorder %s2467_s25, 5 }
  0x1a   : > { %2983 = sst [smem:[#allocation15_spill]] %s2982_s30  ;;  %s3020_s29 = smov (%p42_p5, %s3018_s29), 0 }
  0x1b   : > { %2984 = sst [smem:[#allocation16_spill]] %s3020_s29  ;;  %p2626_p9 = por %p439_p6, %p438_p4 }
  0x1c   : > { %p548_p10 = pnand %p2057_p7, %p547_p8  ;;  %s419_s17 = ssub.s32 %s2463_s24, %s3020_s29 }
  0x1d   : > { %s2985_s16 = scalar_select %p2626_p9, 1, 0 }
  0x1e   : > { %s422_s26 = sadd.s32 1, %s2447_s20  ;;  %p420_p11 = scmp.eq.s32.totalorder %s419_s17, 0 }
  0x1f   : > { %2986 = sst [smem:[#allocation17_spill]] %s2985_s16  ;;  %551 = sbr.rel (%p548_p10) target bundleno = 3640 (0xe38), region = 80 }
  0x20   : > { %s2634_s28 = scalar_select %p420_p11, %s2447_s20, %s422_s26  }
  0x21   : > { %s2955_s27 = sand.u32 (!%p548_p10), 1, %s2443_s19   ;;  %p635_p12 = scmp.lt.s32.totalorder (!%p548_p10), %s2455_s22, 1 }
  0x22   : > { %2987 = sst [smem:[#allocation18_spill]] %s2634_s28  ;;  %s2058_s23 = sshll.u32 (!%p548_p10), %s2955_s27, 4 }
  0x23   : > { %p639_p13 = scmp.lt.s32.totalorder (!%p548_p10), %s2451_s21, 1  ;;  %s2988_s0 = sld [smem:[#allocation19_spill]] (!%p548_p10) }
  0x24   : > { %s2989_s3 = sld [smem:[#allocation20_spill]] (!%p548_p10)  ;;  %s2990_s4 = sld [smem:[#allocation21_spill]] (!%p548_p10) }
  0x25   : > { %s2698_s25 = scalar_lea.vmem (!%p548_p10), [#allocation3], %s2058_s23  ;;  %s2991_s20 = sld [smem:[#allocation9_spill]] (!%p548_p10) }
  0x26   : > { %s636_s18 = scalar_select %p635_p12, %s2455_s22, 1 }
  0x27   : > { %s2643_s16 = scalar_select %p639_p13, %s2451_s21, 1 }
  0x28   : > { %s2059_s17 = sshll.u32 %s636_s18, 3 }
  0x29   : > { %s638_s24 = scalar_lea.vmem %s2988_s0, %s2059_s17  ;;  %s2118_s19 = sshll.u32 %s2643_s16, 4 }
  0x2a   : > { %s2660_s12 = scalar_lea.vmem %s2989_s3, %s2118_s19  ;;  %s2665_s21 = scalar_lea.vmem %s2990_s4, %s2118_s19 }
  0x2b   : > { %s660_s15 = scalar_lea.vmem %s2940_s6, %s2643_s16  ;;  %s2682_s0 = scalar_lea.vmem %s2942_s8, %s2118_s19 }
  0x2c   : > { %s671_s3 = scalar_lea.vmem %s2943_s9, %s2643_s16  ;;  %s2121_s4 = sshll.u32 %s2643_s16, 6 }
  0x2d   : > { %s2692_s28 = scalar_lea.vmem %s2944_s10, %s2121_s4  ;;  %s679_s30 = scalar_lea.vmem %s2945_s11, %s2643_s16 }
  0x2e   : > { %p2068_p0 = scmp.ne.s32.totalorder %s2991_s20, 0 }
  0x2f   : > { %v685_v0 = vld [vmem:[%s638_s24] sm:$0xff] (!%p2068_p0)  ;;  %vm686_vm0 = vcmask (!%p2068_p0), 261120  }
  0x30   : > { %684 = sbr.rel (%p2068_p0) target bundleno = 55 (0x37), region = 84  ;;  %687 = vst.msk [vmem:[#allocation2] sm:$0xff] (!%p2068_p0), %vm686_vm0, %v685_v0 }
  0x37 PF: > { %v2701_v1 = vld [vmem:[#allocation2] sm:$0xff]  ;;  %vm691_vm1 = vcmask 261120   ;;  %v2469_v9 = vmov 0.0   ;;  %vm2470_vm2 = vmmov 0   ;;  %v2330_v10 = vld [vmem:[%s2660_s12 + $0x8] sm:$0xff]   ;;  %s2992_s20 = scalar_lea.vmem %s2935_s1, %s2643_s16  ;;  %s2993_s24 = scalar_lea.vmem %s2936_s2, %s2643_s16  ;;  %vm788_vm3 = vcmask 64512  }
  0x38   : > { %v692_v2 = vsel %vm691_vm1, %v2701_v1, 0.0  ;;  %v2329_v8 = vld [vmem:[%s2660_s12] sm:$0xff]   ;;  %2157 = vmatprep.subr.bf16.mxu0 %v2469_v9  ;;  %2161 = vmatprep.mubr.msk.bf16.mxu0 %vm2470_vm2, %v2469_v9  ;;  %s2471_s13 = smov 64   ;;  %s2472_s22 = smov 96   ;;  %v780_v27 = vlaneseq  ;;  %vm1462_vm5 = vcmask 130048   ;;  %vm1464_vm6 = vcmask 195584  }
  0x39   : > { %693 = vadd.xlane.f32.xlu0 %v692_v2  ;;  %2158 = vmatpush3.bf16.msra.mxu0 %v2329_v8  ;;  %v2069_v15 = vld [vmem:[%s2992_s20] ss:$0 sm:$0xff]  ;;  %s2473_s14 = smov 88   ;;  %s2474_s18 = smov 120  }
  0x3a   : > { %2170 = vmatprep.subr.mxu1 %v2469_v9  ;;  %2159 = vmatprep.subr.bf16.mxu0 %v2469_v9  ;;  %v2070_v17 = vld [vmem:[%s2993_s24] ss:$0 sm:$0xff]  ;;  %v781_v28 = vshrl.u32 %v780_v27, 7  ;;  %v783_v29 = vand.u32 127, %v780_v27  ;;  %s2475_s29 = smov 80   ;;  %s2476_s17 = smov 112  }
  0x3b   : > { %2172 = vmatprep.mubr.msk.f32.mxu1 %vm2470_vm2, %v2469_v9  ;;  %s2477_s27 = smov 72   ;;  %s2478_s26 = smov 104   ;;  %v2331_v27 = vld [vmem:[%s2665_s21] sm:$0xff]  }
  0x3c   : > { %vm784_vm4 = vcmp.gt.s32.totalorder %v783_v29, %v781_v28  ;;  %s2479_s4 = smov 48   ;;  %s2480_s19 = smov 40   ;;  %v2332_v28 = vld [vmem:[%s2665_s21 + $0x8] sm:$0xff]  }
  0x3d   : > { %2160 = vmatpush3.bf16.msra.mxu0 %v2330_v10  ;;  %s2481_s20 = smov 56   ;;  %s2482_s12 = smov 8  }
  0x3e   : > { %2165 = vmatprep.subr.mxu0 %v2469_v9  ;;  %s2483_s23 = smov 16   ;;  %s2484_s24 = smov 24  }
  0xc6   : > { %v694_v3 = vpop.xlane.xlu0 %693 }
  0xc7   : > { %v696_v4 = vmul.f32 0.03125, %v694_v3 }
  0xc9   : > { %v697_v5 = vsub.f32 %v2701_v1, %v696_v4 }
  0xcb   : > { %v698_v6 = vmul.f32 %v697_v5, %v697_v5 }
  0xcd   : > { %v699_v7 = vsel %vm691_vm1, %v698_v6, 0.0 }
  0xce   : > { %700 = vadd.xlane.f32.xlu0 %v699_v7 }
 0x15b   : > { %v701_v11 = vpop.xlane.xlu0 %700 }
 0x15c   : > { %v702_v12 = vmul.f32 0.03125, %v701_v11 }
 0x15e   : > { %v703_v13 = vadd.f32 1e-05, %v702_v12 }
 0x160   : > { %2343 = vrsqrt.f32 %v703_v13 }
 0x16a   : > { %v2344_v14 = vpop.eup %2343 }
 0x16b   : > { %v705_v16 = vmul.f32 %v2344_v14, %v697_v5 }
 0x16d   : > { %v712_v18 = vmul.f32 %v2069_v15, %v705_v16 }
 0x16f   : > { %v719_v19 = vadd.f32 %v2070_v17, %v712_v18 }
 0x171   : > { %v720_v20 = vpack.c.bf16 %v719_v19, %v719_v19 }
 0x173   : > { %2162 = vmatmul.mubr.msk.bf16.vlgmr.msra.gmra.mrb[0].mxu0 %vm691_vm1, %v720_v20 }
 0x174   : > { %2167 = vmatprep.mubr.msk.f32.mxu0 %vm2470_vm2, %v2469_v9 }
 0x246   : > { %v2730_v21 = vpop.f32.mrb[0].mxu0 }
 0x247   : > { %875 = vrot.lane.b32.xlu0 %v2730_v21, %s2471_s13  ;;  %786 = vrot.lane.b32.xlu1 %v2730_v21, %s2472_s22  ;;  %v2163_v22 = vpop.f32.mrb[1].mxu0  ;;  %s2994_s22 = scalar_lea.vmem %s2939_s5, %s2643_s16 }
 0x248   : > { %v777_v23 = vpop.f32.mrb[2].mxu0 }
 0x249   : > { %v2164_v24 = vpop.f32.mrb[3].mxu0 }
 0x24b   : > { %953 = vrot.lane.b32.xlu0 %v2730_v21, %s2473_s14 }
 0x24f   : > { %951 = vrot.lane.b32.xlu0 %v2730_v21, %s2474_s18 }
 0x2b9   : > { %v876_v25 = vpop.permute.xlu0 %875  ;;  %v787_v26 = vpop.permute.xlu1 %786 }
 0x2ba   : > { %2166 = vmatpush3.xpose.msk.msra.mxu0 %vm788_vm3, %v787_v26  ;;  %2171 = vmatpush3.msra.mxu1 %v876_v25 }
 0x2bb   : > { %2175 = vmatprep.subr.mxu1 %v2469_v9  ;;  %2180 = vmatprep.subr.mxu0 %v2469_v9 }
 0x2bd   : > { %2168 = vmatmul.mubr.msk.f32.vlgmr.msra.gmra.mrb[4].mxu0 %vm788_vm3, %v2730_v21  ;;  %v954_v39 = vpop.permute.xlu0 %953 }
 0x2be   : > { %2182 = vmatprep.mubr.msk.f32.mxu0 %vm2470_vm2, %v2469_v9 }
 0x2c1   : > { %v952_v40 = vpop.permute.xlu0 %951 }
 0x390   : > { %v859_v30 = vpop.f32.mrb[4].mxu0 }
 0x391   : > { %v863_v31 = vsel %vm784_vm4, -1e+30, %v859_v30  ;;  %v2169_v32 = vpop.f32.mrb[5].mxu0 }
 0x392   : > { %v864_v33 = vsel %vm788_vm3, %v863_v31, -inf }
 0x393   : > { %865 = vmax.xlane.f32.xlu1 %v864_v33 }
 0x3a4   : > { %1119 = vrot.lane.b32.xlu1 %v2730_v21, %s2475_s29 }
 0x420   : > { %v866_v34 = vpop.xlane.xlu1 %865 }
 0x421   : > { %v867_v35 = vsub.f32 %v863_v31, %v866_v34 }
 0x423   : > { %v868_v36 = vmul.f32 1.442695, %v867_v35 }
 0x424   : > { %v1120_v45 = vpop.permute.xlu1 %1119 }
 0x425   : > { %2345 = vpow2.f32 %v868_v36 }
 0x42f   : > { %v2346_v37 = vpop.eup %2345 }
 0x430   : > { %v870_v38 = vsel %vm788_vm3, %v2346_v37, 0.0 }
 0x431   : > { %871 = vadd.xlane.f32.xlu0 %v870_v38 }
 0x447   : > { %1117 = vrot.lane.b32.xlu0 %v2730_v21, %s2476_s17  ;;  %s2995_s17 = scalar_lea.vmem %s2941_s7, %s2643_s16 }
 0x44b   : > { %1285 = vrot.lane.b32.xlu0 %v2730_v21, %s2477_s27 }
 0x44f   : > { %1283 = vrot.lane.b32.xlu0 %v2730_v21, %s2478_s26  ;;  %s2996_s26 = sld [smem:[#allocation9_spill]] }
 0x455   : > { %p2105_p1 = scmp.ne.s32.totalorder %s2996_s26, 1 }
 0x456   : > { %s2998_s14 = sld [smem:[#allocation22_spill]] (!%p2105_p1)  ;;  %s2999_s29 = sld [smem:[#allocation23_spill]] (!%p2105_p1) }
 0x4be   : > { %v872_v41 = vpop.xlane.xlu0 %871 }
 0x4bf   : > { %2347 = vrcp.f32 %v872_v41 }
 0x4c2   : > { %v1118_v44 = vpop.permute.xlu0 %1117 }
 0x4c6   : > { %v1286_v46 = vpop.permute.xlu0 %1285 }
 0x4c9   : > { %v2348_v42 = vpop.eup %2347 }
 0x4ca   : > { %v874_v43 = vmul.f32 %v2348_v42, %v2346_v37  ;;  %v1284_v47 = vpop.permute.xlu0 %1283  ;;  %v2086_v42 = vld [vmem:[%s2994_s22] ss:$0 sm:$0xff] }
 0x4cc   : > { %2173 = vmatmul.mubr.msk.f32.vlgmr.msra.gmra.mrb[0].mxu1 %vm788_vm3, %v874_v43 }
 0x4cd   : > { %2176 = vmatpush3.xpose.msk.msra.mxu1 %vm788_vm3, %v954_v39  ;;  %2177 = vmatprep.mubr.msk.f32.mxu1 %vm2470_vm2, %v2469_v9 }
 0x4ce   : > { %2185 = vmatprep.subr.mxu1 %v2469_v9 }
 0x4d0   : > { %2178 = vmatmul.mubr.msk.f32.vlgmr.msra.gmra.mrb[2].mxu1 %vm788_vm3, %v952_v40 }
 0x4d1   : > { %2186 = vmatpush3.xpose.msk.msra.mxu1 %vm788_vm3, %v1120_v45  ;;  %2187 = vmatprep.mubr.msk.f32.mxu1 %vm2470_vm2, %v2469_v9 }
 0x4d2   : > { %2195 = vmatprep.subr.mxu1 %v2469_v9 }
 0x4d4   : > { %2188 = vmatmul.mubr.msk.f32.vlgmr.msra.gmra.mrb[4].mxu1 %vm788_vm3, %v1118_v44 }
 0x4d5   : > { %2196 = vmatpush3.xpose.msk.msra.mxu1 %vm788_vm3, %v1286_v46  ;;  %2197 = vmatprep.mubr.msk.f32.mxu1 %vm2470_vm2, %v2469_v9 }
 0x4d6   : > { %2221 = vmatprep.subr.bf16.mxu1 %v2469_v9 }
 0x4d8   : > { %2198 = vmatmul.mubr.msk.f32.vlgmr.msra.gmra.mrb[6].mxu1 %vm788_vm3, %v1284_v47 }
 0x4d9   : > { %2237 = vmatprep.mubr.msk.bf16.mxu1 %vm2470_vm2, %v2469_v9 }
 0x59f   : > { %v2768_v48 = vpop.f32.mrb[0].mxu1 }
 0x5a0   : > { %v2174_v49 = vpop.f32.mrb[1].mxu1 }
 0x5a3   : > { %v1025_v50 = vpop.f32.mrb[2].mxu1 }
 0x5a4   : > { %v1029_v51 = vsel %vm784_vm4, -1e+30, %v1025_v50  ;;  %v2179_v52 = vpop.f32.mrb[3].mxu1 }
 0x5a5   : > { %v1030_v53 = vsel %vm788_vm3, %v1029_v51, -inf }
 0x5a6   : > { %1031 = vmax.xlane.f32.xlu0 %v1030_v53 }
 0x5a7   : > { %v1191_v54 = vpop.f32.mrb[4].mxu1 }
 0x5a8   : > { %v1195_v55 = vsel %vm784_vm4, -1e+30, %v1191_v54  ;;  %v2189_v56 = vpop.f32.mrb[5].mxu1 }
 0x5a9   : > { %v1196_v57 = vsel %vm788_vm3, %v1195_v55, -inf  ;;  %v2334_v56 = vld [vmem:[%s2682_s0 + $0x8] sm:$0xff]  }
 0x5aa   : > { %1197 = vmax.xlane.f32.xlu1 %v1196_v57 }
 0x5ab   : > { %v1357_v58 = vpop.f32.mrb[6].mxu1 }
 0x5ac   : > { %v1361_v59 = vsel %vm784_vm4, -1e+30, %v1357_v58  ;;  %v2199_v60 = vpop.f32.mrb[7].mxu1 }
 0x5ad   : > { %v1362_v61 = vsel %vm788_vm3, %v1361_v59, -inf }
 0x5ae   : > { %1363 = vmax.xlane.f32.xlu0 %v1362_v61  ;;  %v2090_v61 = vld [vmem:[%s660_s15] ss:$0 sm:$0xff] }
 0x5bb   : > { %1207 = vrot.lane.b32.xlu1 %v2730_v21, %s2479_s4  ;;  %s2997_s4 = sld [smem:[#allocation24_spill]] (!%p2105_p1) }
 0x633   : > { %v1032_v62 = vpop.xlane.xlu0 %1031 }
 0x634   : > { %v1033_v63 = vsub.f32 %v1029_v51, %v1032_v62 }
 0x636   : > { %v1034_v0 = vmul.f32 1.442695, %v1033_v63  ;;  %v2091_v63 = vld [vmem:[%s2995_s17] ss:$0 sm:$0xff] }
 0x637   : > { %v1198_v2 = vpop.xlane.xlu1 %1197 }
 0x638   : > { %2349 = vpow2.f32 %v1034_v0  ;;  %v1199_v3 = vsub.f32 %v1195_v55, %v1198_v2  ;;  %v2333_v55 = vld [vmem:[%s2682_s0] sm:$0xff]  }
 0x63a   : > { %v1200_v4 = vmul.f32 1.442695, %v1199_v3 }
 0x63b   : > { %v1364_v5 = vpop.xlane.xlu0 %1363  ;;  %v1208_v16 = vpop.permute.xlu1 %1207 }
 0x63c   : > { %2351 = vpow2.f32 %v1200_v4  ;;  %v1365_v6 = vsub.f32 %v1361_v59, %v1364_v5  ;;  %v2336_v4 = vld [vmem:[%s2692_s28 + $0x8] sm:$0xff]   ;;  %v2337_v5 = vld [vmem:[%s2692_s28 + $0x10] sm:$0xff]  }
 0x63e   : > { %v1366_v7 = vmul.f32 1.442695, %v1365_v6  ;;  %v2338_v6 = vld [vmem:[%s2692_s28 + $0x18] sm:$0xff]  }
 0x640   : > { %2353 = vpow2.f32 %v1366_v7  ;;  %v2339_v7 = vld [vmem:[%s2692_s28 + $0x20] sm:$0xff]  }
 0x642   : > { %v2350_v8 = vpop.eup %2349 }
 0x643   : > { %v1036_v10 = vsel %vm788_vm3, %v2350_v8, 0.0 }
 0x644   : > { %1037 = vadd.xlane.f32.xlu0 %v1036_v10  ;;  %v2341_v10 = vld [vmem:[%s2692_s28 + $0x30] sm:$0xff]  }
 0x646   : > { %v2352_v11 = vpop.eup %2351 }
 0x647   : > { %v1202_v12 = vsel %vm788_vm3, %v2352_v11, 0.0 }
 0x648   : > { %1203 = vadd.xlane.f32.xlu0 %v1202_v12  ;;  %v2092_v12 = vld [vmem:[%s671_s3] ss:$0 sm:$0xff] }
 0x64a   : > { %v2354_v13 = vpop.eup %2353 }
 0x64b   : > { %v1368_v14 = vsel %vm788_vm3, %v2354_v13, 0.0 }
 0x64c   : > { %1369 = vadd.xlane.f32.xlu1 %v1368_v14 }
 0x65d   : > { %1373 = vrot.lane.b32.xlu1 %v2730_v21, %s2480_s19 }
 0x65e   : > { %1041 = vrot.lane.b32.xlu0 %v2730_v21, %s2481_s20 }
 0x6d1   : > { %v1038_v15 = vpop.xlane.xlu0 %1037 }
 0x6d2   : > { %2355 = vrcp.f32 %v1038_v15 }
 0x6d5   : > { %v1204_v17 = vpop.xlane.xlu0 %1203 }
 0x6d6   : > { %2357 = vrcp.f32 %v1204_v17 }
 0x6d9   : > { %v1370_v18 = vpop.xlane.xlu1 %1369  ;;  %v1042_v19 = vpop.permute.xlu0 %1041 }
 0x6da   : > { %2359 = vrcp.f32 %v1370_v18  ;;  %2181 = vmatpush3.msra.mxu0 %v1042_v19 }
 0x6db   : > { %2190 = vmatprep.subr.mxu0 %v2469_v9 }
 0x6dc   : > { %v2356_v20 = vpop.eup %2355 }
 0x6dd   : > { %v1040_v22 = vmul.f32 %v2356_v20, %v2350_v8  ;;  %v1374_v24 = vpop.permute.xlu1 %1373  ;;  %v2340_v8 = vld [vmem:[%s2692_s28 + $0x28] sm:$0xff]  }
 0x6df   : > { %2183 = vmatmul.mubr.msk.f32.vlgmr.msra.gmra.mrb[6].mxu0 %vm788_vm3, %v1040_v22 }
 0x6e0   : > { %v2358_v23 = vpop.eup %2357  ;;  %2191 = vmatpush3.msra.mxu0 %v1208_v16  ;;  %2192 = vmatprep.mubr.msk.f32.mxu0 %vm2470_vm2, %v2469_v9 }
 0x6e1   : > { %v1206_v21 = vmul.f32 %v2358_v23, %v2352_v11  ;;  %2200 = vmatprep.subr.mxu0 %v2469_v9  ;;  %v2342_v11 = vld [vmem:[%s2692_s28 + $0x38] sm:$0xff]  }
 0x6e3   : > { %2193 = vmatmul.mubr.msk.f32.vlgmr.msra.gmra.mrb[8].mxu0 %vm788_vm3, %v1206_v21 }
 0x6e4   : > { %v2360_v25 = vpop.eup %2359  ;;  %2201 = vmatpush3.msra.mxu0 %v1374_v24  ;;  %2202 = vmatprep.mubr.msk.f32.mxu0 %vm2470_vm2, %v2469_v9 }
 0x6e5   : > { %v1372_v26 = vmul.f32 %v2360_v25, %v2354_v13  ;;  %2205 = vmatprep.subr.bf16.mxu0 %v2469_v9 }
 0x6e7   : > { %2203 = vmatmul.mubr.msk.f32.vlgmr.msra.gmra.mrb[10].mxu0 %vm788_vm3, %v1372_v26 }
 0x6e8   : > { %2209 = vmatprep.mubr.msk.bf16.mxu0 %vm2470_vm2, %v2469_v9  ;;  %2206 = vmatpush3.bf16.msra.mxu0 %v2331_v27  ;;  %v2096_v27 = vld [vmem:[%s679_s30] ss:$0 sm:$0xff] }
 0x6e9   : > { %2207 = vmatprep.subr.bf16.mxu0 %v2469_v9 }
 0x6ec   : > { %2208 = vmatpush3.bf16.msra.mxu0 %v2332_v28 }
 0x6ed   : > { %2213 = vmatprep.subr.bf16.mxu0 %v2469_v9 }
 0x7b2   : > { %v1113_v29 = vpop.f32.mrb[6].mxu0 }
 0x7b3   : > { %1450 = vrot.lane.b32.xlu1 %v1113_v29, %s2482_s12  ;;  %v2184_v30 = vpop.f32.mrb[7].mxu0 }
 0x7b6   : > { %v1279_v31 = vpop.f32.mrb[8].mxu0 }
 0x7b7   : > { %1454 = vrot.lane.b32.xlu0 %v1279_v31, %s2483_s23  ;;  %v2194_v32 = vpop.f32.mrb[9].mxu0 }
 0x7ba   : > { %v1445_v33 = vpop.f32.mrb[10].mxu0 }
 0x7bb   : > { %1458 = vrot.lane.b32.xlu1 %v1445_v33, %s2484_s24  ;;  %v2204_v34 = vpop.f32.mrb[11].mxu0 }
 0x825   : > { %v1451_v35 = vpop.permute.xlu1 %1450 }
 0x826   : > { %v1461_v37 = vsel %vm788_vm3, %v2768_v48, %v1451_v35 }
 0x829   : > { %v1455_v36 = vpop.permute.xlu0 %1454 }
 0x82a   : > { %v1463_v38 = vsel %vm1462_vm5, %v1461_v37, %v1455_v36 }
 0x82d   : > { %v1459_v39 = vpop.permute.xlu1 %1458 }
 0x82e   : > { %v1465_v40 = vsel %vm1464_vm6, %v1463_v38, %v1459_v39 }
 0x82f   : > { %v1466_v41 = vpack.c.bf16 %v1465_v40, %v1465_v40  ;;  %v2365_v40 = vld [vmem:[%s2997_s4 + $0x4] ss:$8 sps:$4 sm:$0xff] (!%p2105_p1)  }
 0x831   : > { %2210 = vmatmul.mubr.msk.bf16.vlgmr.msra.gmra.mrb[12].mxu0 %vm691_vm1, %v1466_v41  ;;  %v2367_v41 = vld [vmem:[%s2997_s4] ss:$8 sps:$4 sm:$0xff] (!%p2105_p1)  }
 0x832   : > { %2217 = vmatprep.mubr.msk.bf16.mxu0 %vm2470_vm2, %v2469_v9  ;;  %2214 = vmatpush3.bf16.msra.mxu0 %v2333_v55 }
 0x833   : > { %2215 = vmatprep.subr.bf16.mxu0 %v2469_v9 }
 0x836   : > { %2216 = vmatpush3.bf16.msra.mxu0 %v2334_v56 }
 0x837   : > { %1814 = vmatprep.subr.bf16.mxu0 (!%p2105_p1), %v2365_v40 }
 0x904   : > { %v1527_v43 = vpop.f32.mrb[12].mxu0 }
 0x905   : > { %v1528_v44 = vadd.f32 %v2086_v42, %v1527_v43  ;;  %v2211_v45 = vpop.f32.mrb[13].mxu0  ;;  %v2368_v42 = vld [vmem:[%s2997_s4 + $0x14] ss:$8 sps:$4 sm:$0xff] (!%p2105_p1)   ;;  %v2485_v43 = vmov (!%p2105_p1), 0  }
 0x906   : > { %v1530_v46 = vpop.f32.mrb[14].mxu0 }
 0x907   : > { %v2809_v47 = vadd.f32 %v1528_v44, %v2701_v1  ;;  %v2212_v48 = vpop.f32.mrb[15].mxu0  ;;  %v2335_v1 = vld [vmem:[%s2692_s28] sm:$0xff]   ;;  %v2370_v44 = vld [vmem:[%s2997_s4 + $0x10] ss:$8 sps:$4 sm:$0xff] (!%p2105_p1)  }
 0x908   : > { %2222 = vmatpush3.bf16.msra.mxu1 %v2335_v1 }
 0x909   : > { %v1536_v49 = vsel %vm691_vm1, %v2809_v47, 0.0  ;;  %2223 = vmatprep.subr.bf16.mxu1 %v2469_v9 }
 0x90a   : > { %1537 = vadd.xlane.f32.xlu0 %v1536_v49  ;;  %v2106_v49 = vld [vmem:[%s2998_s14] ss:$0 sm:$0xff] (!%p2105_p1) }
 0x90c   : > { %2224 = vmatpush3.bf16.msra.mxu1 %v2336_v4 }
 0x90d   : > { %2225 = vmatprep.subr.bf16.mxu1 %v2469_v9 }
 0x910   : > { %2226 = vmatpush3.bf16.msra.mxu1 %v2337_v5 }
 0x911   : > { %2227 = vmatprep.subr.bf16.mxu1 %v2469_v9 }
 0x914   : > { %2228 = vmatpush3.bf16.msra.mxu1 %v2338_v6 }
 0x915   : > { %2229 = vmatprep.subr.bf16.mxu1 %v2469_v9 }
 0x918   : > { %2230 = vmatpush3.bf16.msra.mxu1 %v2339_v7 }
 0x919   : > { %2231 = vmatprep.subr.bf16.mxu1 %v2469_v9 }
 0x91c   : > { %2232 = vmatpush3.bf16.msra.mxu1 %v2340_v8 }
 0x91d   : > { %2233 = vmatprep.subr.bf16.mxu1 %v2469_v9 }
 0x920   : > { %2234 = vmatpush3.bf16.msra.mxu1 %v2341_v10 }
 0x921   : > { %2235 = vmatprep.subr.bf16.mxu1 %v2469_v9 }
 0x924   : > { %2236 = vmatpush3.bf16.msra.mxu1 %v2342_v11 }
 0x997   : > { %v1538_v50 = vpop.xlane.xlu0 %1537 }
 0x998   : > { %v1539_v51 = vmul.f32 0.03125, %v1538_v50 }
 0x99a   : > { %v1540_v52 = vsub.f32 %v2809_v47, %v1539_v51  ;;  %v2107_v51 = vld [vmem:[%s2999_s29] ss:$0 sm:$0xff] (!%p2105_p1) }
 0x99c   : > { %v1541_v53 = vmul.f32 %v1540_v52, %v1540_v52 }
 0x99e   : > { %v1542_v54 = vsel %vm691_vm1, %v1541_v53, 0.0 }
 0x99f   : > { %1543 = vadd.xlane.f32.xlu1 %v1542_v54 }
 0xa2c   : > { %v1544_v57 = vpop.xlane.xlu1 %1543 }
 0xa2d   : > { %v1545_v58 = vmul.f32 0.03125, %v1544_v57 }
 0xa2f   : > { %v1546_v59 = vadd.f32 1e-05, %v1545_v58 }
 0xa31   : > { %2361 = vrsqrt.f32 %v1546_v59 }
 0xa3b   : > { %v2362_v60 = vpop.eup %2361 }
 0xa3c   : > { %v1548_v62 = vmul.f32 %v2362_v60, %v1540_v52 }
 0xa3e   : > { %v1555_v0 = vmul.f32 %v2090_v61, %v1548_v62 }
 0xa40   : > { %v1562_v2 = vadd.f32 %v2091_v63, %v1555_v0 }
 0xa42   : > { %v1563_v3 = vpack.c.bf16 %v1562_v2, %v1562_v2 }
 0xa44   : > { %2218 = vmatmul.mubr.msk.bf16.vlgmr.msra.gmra.mrb[16].mxu0 %vm691_vm1, %v1563_v3 }
 0xa45   : > { %1846 = vmatprep.mubr.bf16.mxu0 (!%p2105_p1), %v2485_v43  ;;  %1815 = vmatpush1.bf16.msra.mxu0 (!%p2105_p1), %v2367_v41 }
 0xa46   : > { %1816 = vmatprep.subr.bf16.mxu0 (!%p2105_p1), %v2368_v42 }
 0xa49   : > { %1817 = vmatpush1.bf16.msra.mxu0 (!%p2105_p1), %v2370_v44 }
 0xb17   : > { %v1624_v13 = vpop.f32.mrb[16].mxu0 }
 0xb18   : > { %v1625_v14 = vadd.f32 %v2092_v12, %v1624_v13  ;;  %v2219_v15 = vpop.f32.mrb[17].mxu0 }
 0xb19   : > { %v1627_v16 = vpop.f32.mrb[18].mxu0 }
 0xb1a   : > { %v1631_v17 = vmul.f32 0.044715, %v1625_v14  ;;  %v2220_v18 = vpop.f32.mrb[19].mxu0  ;;  %v1630_v9 = vmul.f32 0.5, %v1625_v14 }
 0xb1c   : > { %v1632_v19 = vmul.f32 %v1631_v17, %v1625_v14 }
 0xb1e   : > { %v1633_v20 = vmul.f32 %v1632_v19, %v1625_v14 }
 0xb20   : > { %v1634_v22 = vadd.f32 %v1633_v20, %v1625_v14 }
 0xb22   : > { %v1635_v23 = vmul.f32 0.7978846, %v1634_v22 }
 0xb24   : > { %2363 = vtanh.f32 %v1635_v23 }
 0xb2e   : > { %v2364_v21 = vpop.eup %2363 }
 0xb2f   : > { %v1637_v24 = vadd.f32 1.0, %v2364_v21 }
 0xb31   : > { %v1638_v25 = vmul.f32 %v1637_v24, %v1630_v9 }
 0xb33   : > { %v1639_v26 = vpack.c.bf16 %v1638_v25, %v1638_v25 }
 0xb35   : > { %2238 = vmatmul.mubr.bf16.vlgmr.msra.gmra.mrb[8].mxu1 %v1639_v26 }
 0xc07   : > { %1756 = sbr.rel (%p2105_p1) target bundleno = 3615 (0xe1f), region = 88 }
 0xc08   : > { %v1745_v28 = vpop.f32.mrb[8].mxu1 }
 0xc09   : > { %v1746_v29 = vadd.f32 %v2096_v27, %v1745_v28  ;;  %v2239_v30 = vpop.f32.mrb[9].mxu1 }
 0xc0a   : > { %v1748_v31 = vpop.f32.mrb[10].mxu1 }
 0xc0b   : > { %v1751_v32 = vadd.f32 %v1746_v29, %v2809_v47  ;;  %v2240_v33 = vpop.f32.mrb[11].mxu1 }
 0xc0d   : > { %1752 = vst.msk [vmem:[#allocation2] sm:$0xff] %vm691_vm1, %v1751_v32  ;;  %v1759_v34 = vsel (!%p2105_p1), %vm691_vm1, %v1751_v32, 0.0 }
 0xc0e   : > { %1760 = vadd.xlane.f32.xlu0 %v1759_v34 }
 0xc9b   : > { %v1761_v35 = vpop.xlane.xlu0 %1760 }
 0xc9c   : > { %v1762_v36 = vmul.f32 0.03125, %v1761_v35 }
 0xc9e   : > { %v1763_v37 = vsub.f32 %v1751_v32, %v1762_v36 }
 0xca0   : > { %v1764_v38 = vmul.f32 %v1763_v37, %v1763_v37 }
 0xca2   : > { %v1765_v39 = vsel %vm691_vm1, %v1764_v38, 0.0 }
 0xca3   : > { %1766 = vadd.xlane.f32.xlu0 %v1765_v39 }
 0xd30   : > { %v1767_v45 = vpop.xlane.xlu0 %1766 }
 0xd31   : > { %v1768_v46 = vmul.f32 0.03125, %v1767_v45 }
 0xd33   : > { %v1769_v47 = vadd.f32 1e-05, %v1768_v46 }
 0xd35   : > { %2371 = vrsqrt.f32 %v1769_v47 }
 0xd3f   : > { %v2372_v48 = vpop.eup %2371 }
 0xd40   : > { %v1771_v50 = vmul.f32 %v2372_v48, %v1763_v37 }
 0xd42   : > { %v1778_v52 = vmul.f32 %v2106_v49, %v1771_v50 }
 0xd44   : > { %v1785_v53 = vadd.f32 %v2107_v51, %v1778_v52 }
 0xd46   : > { %v1786_v54 = vpack.c.bf16 %v1785_v53, %v1785_v53 }
 0xd48   : > { %2112 = vmatmul.mubr.msk.bf16.vlgmr.msra.gmra.mrb[0].mxu0 %vm691_vm1, %v1786_v54 }
 0xe1b   : > { %v1848_v55 = vpop.f32.mrb[0].mxu0 }
 0xe1c   : > { %1855 = vst [vmem:[%s2698_s25] sm:$0xff] %v1848_v55  ;;  %v1850_v56 = vpop.f32.mrb[1].mxu0 }
 0xe1d   : > { %1856 = vst [vmem:[%s2698_s25 + $0x8] sm:$0xff] %v1850_v56  ;;  %v1852_v1 = vpop.f32.mrb[2].mxu0 }
 0xe1e   : > { %v1853_v57 = vpop.f32.mrb[3].mxu0 }
 0xe1f PF: > { %s3000_s17 = sld [smem:[#allocation10_spill]]  ;;  %s3001_s15 = sld [smem:[#allocation7_spill]] }
 0xe20   : > { %s3003_s16 = sld [smem:[#allocation25_spill]]  ;;  %s1872_s19 = sshll.u32 %s2698_s25, 4  ;;  %s1873_s19 = int_to_ptr.vmem [resolvable:$true] %s1872_s19 }
 0xe21   : > { %s2373_s23 = scalar_lea.vmem %s1873_s19, 256  ;;  %s2486_s24 = smov [#allocation3]  }
 0xe22   : > { %p2374_p2 = scmp.ne.s32.totalorder %s1873_s19, %s2373_s23  ;;  %s2377_s21 = sshll.u32 %s2486_s24, 4  ;;  %s2378_s21 = int_to_ptr.vmem [resolvable:$false] %s2377_s21 }
 0xe23   : > { %s2379_s13 = scalar_lea.vmem %s2378_s21, 512  ;;  %p2380_p6 = scmp.lt.s32.totalorder %s1873_s19, %s2378_s21 }
 0xe24   : > { %p2375_p4 = pnand %p2374_p2, %p2616_p3  ;;  %p2381_p7 = scmp.lt.s32.totalorder %s2379_s13, %s2373_s23 }
 0xe25   : > { %s2122_s28 = sshll.u32 %s3000_s17, 8  ;;  %s3004_s20 = sand.u32 1, %s3001_s15  }
 0xe26   : > { %s2884_s30 = scalar_lea.hbm %s3003_s16, %s2122_s28  ;;  %s1858_s12 = scalar_lea.sflag [#allocation4], %s3004_s20 }
 0xe27   : > { %p2376_p5 = pneg %p2375_p4  ;;  %p2382_p8 = por %p2381_p7, %p2380_p6 }
 0xe29   : > { %p2383_p10 = pnand %p2382_p8, %p2376_p5 }
 0xe2b   : > { %2386 = shalt.err (!%p2383_p10)
}
 0xe2c   : > { %s2387_s25 = scalar_lea.hbm %s2884_s30, 256  ;;  %s2391_s18 = scalar_lea.hbm %s3003_s16, 512 }
 0xe2d   : > { %p2388_p11 = scmp.ne.s32.totalorder %s2884_s30, %s2387_s25  ;;  %p2392_p0 = scmp.lt.u32.totalorder %s2884_s30, %s3003_s16 }
 0xe2e   : > { %p2393_p1 = scmp.lt.u32.totalorder %s2391_s18, %s2387_s25  ;;  %p2395_p4 = scmp.lt.u32.totalorder %s2387_s25, %s2884_s30 }
 0xe2f   : > { %p2389_p12 = pnand %p2388_p11, %p2616_p3 }
 0xe30   : > { %p2394_p2 = por %p2393_p1, %p2392_p0 }
 0xe31   : > { %p2390_p13 = pneg %p2389_p12 }
 0xe32   : > { %p2396_p5 = por %p2395_p4, %p2394_p2 }
 0xe34   : > { %p2397_p6 = pnand %p2396_p5, %p2390_p13 }
 0xe36   : > { %2400 = shalt.err (!%p2397_p6)
}
 0xe37   : > { %2241 = dma.vmem_to_hbm [thread:$0]  (%p2616_p3), %s1873_s19, 256, %s2884_s30, %s1858_s12  }
 0xe38 PF: > { %s3005_s17 = sld [smem:[#allocation13_spill]]  ;;  %s3006_s15 = sld [smem:[#allocation6_spill]] }
 0xe3e   : > { %p2247_p7 = scmp.ge.s32.totalorder %s3005_s17, 2  ;;  %s1884_s3 = sand.u32 1, %s3006_s15  }
 0xe3f   : > { %s1885_s26 = scalar_lea.sflag [#allocation4], %s1884_s3 }
 0xe40   : > { %p2244_p8 = pnand %p2247_p7, %p2626_p9 }
 0xe42   : > { %2434 = dma.done.wait (!%p2244_p8), %s1885_s26, 256  }
 0xe43   : > { %2436 = vsyncadd (!%p2244_p8), %s1885_s26, 4294967040  ;;  %s28_s25 = sadd.s32 1, %s3005_s17   ;;  %s3008_s18 = sld [smem:[#allocation7_spill]] }
 0xe44   : > { %p25_p10 = scmp.ge.s32.totalorder %s28_s25, 6   ;;  %s3009_s19 = sld [smem:[#allocation8_spill]] }
 0xe45   : > { %s3010_s20 = sld [smem:[#allocation18_spill]]  ;;  %s3011_s21 = sld [smem:[#allocation11_spill]] }
 0xe46   : > { %s3012_s22 = sld [smem:[#allocation12_spill]]  ;;  %s3013_s23 = sld [smem:[#allocation14_spill]] }
 0xe47   : > { %s3014_s24 = sld [smem:[#allocation16_spill]]  ;;  %27 = sbr.rel (!%p25_p10) target bundleno = 13 (0xd), region = 156 }
 0xe4e   :  { %1890 = vsyncpa [#allocation4], 1 }
 0xe4f   :  { %1892 = vsyncpa [#allocation4 + $0x1], 1 }

</bundles_post_ra>
